<compile_context>
chip_gen: v7x
topology: tpu7x:2x2x1
jax: 0.10.0
libtpu: 0.0.40
codegen_flags: <defaults>
</compile_context>

<pallas_src>
import jax
import jax.numpy as jnp
from jax.experimental import pallas as pl
from jax.experimental.pallas import tpu as pltpu

EPS = 1e-5
LANE = 128
_SMALL_BATCH = 64  # below this, moments via XLU sublane reduce, not MXU


def cnet_kernel(x_ref, gamma_ref, w_ref, fb_ref, score_ref):
    # x_ref:     (N, D)   input batch
    # gamma_ref: (1, D)   BatchNorm weight
    # w_ref:     (D, Cp)  Linear weight, pre-transposed and lane-padded to Cp
    # fb_ref:    (1, Cp)  fused bias = beta @ W^T + b, lane-padded
    # score_ref: (N, Cp)  lane-dense logits (consumer slices back to C)
    x = x_ref[...]
    n = x.shape[0]
    cp = w_ref.shape[1]

    # --- batch statistics ---------------------------------------------------
    if n <= _SMALL_BATCH:
        # One XLU sublane reduce per moment; the XLU slot is otherwise idle.
        sum_x = jnp.sum(x, axis=0, keepdims=True)                       # (1, D)
        sum_x2 = jnp.sum(x * x, axis=0, keepdims=True)                  # (1, D)
    else:
        # Tall batch: one MXU pass per moment, full-precision operands.
        ones = jnp.ones((1, n), dtype=jnp.float32)
        sum_x = jnp.dot(ones, x,
                        preferred_element_type=jnp.float32,
                        precision=jax.lax.Precision.HIGHEST)            # (1, D)
        sum_x2 = jnp.dot(ones, x * x,
                         preferred_element_type=jnp.float32,
                         precision=jax.lax.Precision.HIGHEST)           # (1, D)
    inv_n = 1.0 / n
    mean = sum_x * inv_n
    # biased variance (training mode); clamp: E[x^2]-mean^2 can cancel < 0
    var = jnp.maximum(sum_x2 * inv_n - mean * mean, 0.0)

    # per-feature scale s = gamma / sqrt(var + eps)
    s = gamma_ref[...] * jax.lax.rsqrt(var + EPS)                       # (1, D)

    # --- folded BN + Linear ---------------------------------------------------
    # score = ((x - mean) * s) @ W + (beta @ W + b)
    #       = (x * s) @ W - ((mean * s) @ W) + fused_bias
    w = w_ref[...]                                                      # (D, Cp)
    corr = fb_ref[...] - jnp.dot(mean * s, w,
                                 preferred_element_type=jnp.float32,
                                 precision=jax.lax.Precision.HIGHEST)   # (1, Cp)

    if n > cp:
        # Scale the weight (D*Cp VPU ops) instead of the activation (N*D).
        s_col = jnp.transpose(s)                                        # (D, 1)
        score_ref[...] = (
            jnp.dot(x, w * s_col,
                    preferred_element_type=jnp.float32,
                    precision=jax.lax.Precision.HIGHEST) + corr)
    else:
        score_ref[...] = (
            jnp.dot(x * s, w,
                    preferred_element_type=jnp.float32,
                    precision=jax.lax.Precision.HIGHEST) + corr)


def prepare_params(gamma, beta, w, b):
    """One-time parameter preprocessing (do NOT run per forward call).

    gamma/beta: (D,) BatchNorm affine; w: (C, D) PyTorch Linear layout; b: (C,).
    Returns kernel-ready arrays: gamma (1, D), w_pad (D, Cp), fb_pad (1, Cp), c.
    """
    d = w.shape[1]
    c = w.shape[0]
    cp = ((c + LANE - 1) // LANE) * LANE            # lane-dense output width

    w_t = jnp.transpose(w)                                              # (D, C)
    # beta and the Linear bias are frozen zeros in the module; fold anyway so
    # the algebra stays general.
    fused_bias = beta.reshape(1, d) @ w_t + b.reshape(1, c)             # (1, C)

    w_pad = jnp.pad(w_t, ((0, 0), (0, cp - c)))                         # (D, Cp)
    fb_pad = jnp.pad(fused_bias, ((0, 0), (0, cp - c)))                 # (1, Cp)
    return {
        "gamma": gamma.reshape(1, d).astype(jnp.float32),
        "w_pad": w_pad.astype(jnp.float32),
        "fb_pad": fb_pad.astype(jnp.float32),
        "class_num": c,
    }


def c_net_forward(x, params):
    """x: (N, D) f32. Returns the lane-dense padded score (N, Cp).

    The consumer slices [:, :params['class_num']] lazily; keeping the padded
    array out of the hot path avoids an extra XLA copy per call.
    """
    n, _ = x.shape
    cp = params["w_pad"].shape[1]

    vmem = pl.BlockSpec(memory_space=pltpu.MemorySpace.VMEM)
    score_pad = pl.pallas_call(
        cnet_kernel,
        out_shape=jax.ShapeDtypeStruct((n, cp), jnp.float32),
        in_specs=[vmem, vmem, vmem, vmem],
        out_specs=vmem,
    )(x, params["gamma"], params["w_pad"], params["fb_pad"])
    return score_pad


def reference_forward(x, gamma, beta, w, b):
    # Straight transcription of BatchNorm1d(train) + Linear (PyTorch math).
    mean = jnp.mean(x, axis=0, keepdims=True)
    var = jnp.mean((x - mean) ** 2, axis=0, keepdims=True)
    feat = (x - mean) / jnp.sqrt(var + EPS) * gamma.reshape(1, -1) + beta.reshape(1, -1)
    return feat @ w.T + b.reshape(1, -1)


if __name__ == "__main__":
    # Small shapes consistent with the module: batch=8, input_dim=32, class_num=16
    N, D, C = 8, 32, 16

    key = jax.random.PRNGKey(0)
    kx, kw = jax.random.split(key)

    x = jax.random.normal(kx, (N, D), dtype=jnp.float32)

    # BatchNorm1d params: weight = 1, bias = 0 (bias frozen in the module)
    gamma = jnp.ones((D,), dtype=jnp.float32)
    beta = jnp.zeros((D,), dtype=jnp.float32)

    # Linear params per weights_init_classifier: weight ~ N(0, 0.001), bias = 0
    w = 0.001 * jax.random.normal(kw, (C, D), dtype=jnp.float32)   # PyTorch (out, in)
    b = jnp.zeros((C,), dtype=jnp.float32)

    # Parameter prep runs once, outside the per-call forward path.
    params = jax.tree.map(jax.block_until_ready, prepare_params(gamma, beta, w, b))

    score_pad = c_net_forward(x, params)
    jax.block_until_ready(score_pad)

    # Consumer-side (lazy) slice back to the true class count.
    score = score_pad[:, :params["class_num"]]

    ref = reference_forward(x, gamma, beta, w, b)
    assert score.shape == (N, C)
    assert jnp.allclose(score, ref, atol=1e-5, rtol=1e-5)

    print("KERNEL_OK")
</pallas_src>

<mosaic_0001>
module attributes {stable_mosaic.version = 11 : i64} {
  func.func @cnet_kernel(%arg0: memref<8x32xf32, #tpu.memory_space<vmem>>, %arg1: memref<1x32xf32, #tpu.memory_space<vmem>>, %arg2: memref<32x128xf32, #tpu.memory_space<vmem>>, %arg3: memref<1x128xf32, #tpu.memory_space<vmem>>, %arg4: memref<8x128xf32, #tpu.memory_space<vmem>>) attributes {dimension_semantics = [], scalar_prefetch = 0 : i64, scratch_operands = 0 : i64, tpu.core_type = #tpu.core_type<tc>} {
    %c0 = arith.constant 0 : index
    %c0_0 = arith.constant 0 : index
    %0 = vector.load %arg0[%c0, %c0_0] : memref<8x32xf32, #tpu.memory_space<vmem>>, vector<8x32xf32>
    %cst = arith.constant dense<0.000000e+00> : vector<32xf32>
    %1 = vector.multi_reduction <add>, %0, %cst [0] : vector<8x32xf32> to vector<32xf32>
    %2 = vector.shape_cast %1 : vector<32xf32> to vector<1x32xf32>
    %3 = arith.mulf %0, %0 : vector<8x32xf32>
    %cst_1 = arith.constant dense<0.000000e+00> : vector<32xf32>
    %4 = vector.multi_reduction <add>, %3, %cst_1 [0] : vector<8x32xf32> to vector<32xf32>
    %5 = vector.shape_cast %4 : vector<32xf32> to vector<1x32xf32>
    %cst_2 = arith.constant 1.250000e-01 : f32
    %6 = vector.broadcast %cst_2 : f32 to vector<1x32xf32>
    %7 = arith.mulf %2, %6 : vector<1x32xf32>
    %cst_3 = arith.constant 1.250000e-01 : f32
    %8 = vector.broadcast %cst_3 : f32 to vector<1x32xf32>
    %9 = arith.mulf %5, %8 : vector<1x32xf32>
    %10 = arith.mulf %7, %7 : vector<1x32xf32>
    %11 = arith.subf %9, %10 : vector<1x32xf32>
    %cst_4 = arith.constant 0.000000e+00 : f32
    %12 = vector.broadcast %cst_4 : f32 to vector<1x32xf32>
    %13 = arith.maximumf %11, %12 : vector<1x32xf32>
    %c0_5 = arith.constant 0 : index
    %c0_6 = arith.constant 0 : index
    %14 = vector.load %arg1[%c0_5, %c0_6] : memref<1x32xf32, #tpu.memory_space<vmem>>, vector<1x32xf32>
    %cst_7 = arith.constant 9.99999974E-6 : f32
    %15 = vector.broadcast %cst_7 : f32 to vector<1x32xf32>
    %16 = arith.addf %13, %15 : vector<1x32xf32>
    %17 = math.rsqrt %16 : vector<1x32xf32>
    %18 = arith.mulf %14, %17 : vector<1x32xf32>
    %c0_8 = arith.constant 0 : index
    %c0_9 = arith.constant 0 : index
    %19 = vector.load %arg2[%c0_8, %c0_9] : memref<32x128xf32, #tpu.memory_space<vmem>>, vector<32x128xf32>
    %c0_10 = arith.constant 0 : index
    %c0_11 = arith.constant 0 : index
    %20 = vector.load %arg3[%c0_10, %c0_11] : memref<1x128xf32, #tpu.memory_space<vmem>>, vector<1x128xf32>
    %21 = arith.mulf %7, %18 : vector<1x32xf32>
    %cst_12 = arith.constant dense<0.000000e+00> : vector<1x128xf32>
    %22 = tpu.matmul %21, %19, %cst_12 {dimension_numbers = #tpu.dot_dimension_numbers<[1], [0], [0], [1], [0, 0, 1, 1], [], []>, precision = #tpu.contract_precision<fp32>} : vector<1x32xf32>, vector<32x128xf32>, vector<1x128xf32> -> vector<1x128xf32>
    %23 = arith.subf %20, %22 : vector<1x128xf32>
    %24 = vector.broadcast %18 : vector<1x32xf32> to vector<8x32xf32>
    %25 = arith.mulf %0, %24 : vector<8x32xf32>
    %cst_13 = arith.constant dense<0.000000e+00> : vector<8x128xf32>
    %26 = tpu.matmul %25, %19, %cst_13 {dimension_numbers = #tpu.dot_dimension_numbers<[1], [0], [0], [1], [0, 0, 1, 1], [], []>, precision = #tpu.contract_precision<fp32>} : vector<8x32xf32>, vector<32x128xf32>, vector<8x128xf32> -> vector<8x128xf32>
    %27 = vector.broadcast %23 : vector<1x128xf32> to vector<8x128xf32>
    %28 = arith.addf %26, %27 : vector<8x128xf32>
    %c0_14 = arith.constant 0 : index
    %c0_15 = arith.constant 0 : index
    %29 = vector.load %arg4[%c0_14, %c0_15] : memref<8x128xf32, #tpu.memory_space<vmem>>, vector<8x128xf32>
    tpu.vector_store %arg4[%c0_14, %c0_15], %28 {strides = array<i32>} : memref<8x128xf32, #tpu.memory_space<vmem>>, vector<8x128xf32>,
    return
  }
}

</mosaic_0001>

<bundles_post_ra>
// kernel: tpu_custom_call.1
= control target key start
LH: loop header
LB: loop body
LE: loop exit
PB: predicated region body
PF: predicated region fallthrough
CT: control target
= control target key end

     0   :  { %9 = vsyncpa [#allocation3], 0  ;;  %s1655_s0 = inlined_call_operand.hbm [shape: f32[8,32], index: 0, kind: input, shape index: {}]   ;;  %s1656_s1 = inlined_call_operand.vmem [shape: f32[1,32], index: 1, kind: input, shape index: {}]   ;;  %s1657_s2 = inlined_call_operand.hbm [shape: f32[32,128], index: 2, kind: input, shape index: {}]   ;;  %s1658_s3 = inlined_call_operand.vmem [shape: f32[1,128], index: 3, kind: input, shape index: {}]   ;;  %s1659_s4 = inlined_call_operand.hbm [shape: f32[8,128], index: 4, kind: output, shape index: {}]  }
   0x1   :  { %10 = vsyncpa [#allocation6], 0 }
   0x2   :  { %11 = vsyncpa [#allocation4], 0  ;;  %s1450_s15 = smov [#allocation2]   ;;  %s1451_s17 = smov [#allocation5]  }
   0x3   :  { %s18_s16 = sshll.u32 %s1450_s15, 4  ;;  %s29_s18 = sshll.u32 %s1451_s17, 4  ;;  %s19_s16 = int_to_ptr.vmem [resolvable:$true] %s18_s16  ;;  %s1483_s18 = int_to_ptr.vmem [resolvable:$true] %s29_s18 }
   0x4   :  { %s1378_s21 = scalar_lea.hbm %s1655_s0, 128 }
   0x5   :  { %p1379_p0 = scmp.ne.s32.totalorder %s1655_s0, %s1378_s21  ;;  %p1382_p1 = scmp.lt.u32.totalorder %s1378_s21, %s1655_s0 }
   0x7   :  { %p1384_p2 = pnand %p1382_p1, %p1379_p0 }
   0x9   :  { %1387 = shalt.err (!%p1384_p2)
}
   0xa   :  { %s1388_s26 = scalar_lea.vmem %s19_s16, 128  ;;  %p1393_p4 = scmp.lt.s32.totalorder %s19_s16, %s19_s16 }
   0xb   :  { %p1389_p3 = scmp.ne.s32.totalorder %s19_s16, %s1388_s26  ;;  %p1394_p5 = scmp.lt.s32.totalorder %s1388_s26, %s1388_s26 }
   0xd   :  { %p1395_p6 = por %p1394_p5, %p1393_p4 }
   0xf   :  { %p1396_p7 = pnand %p1395_p6, %p1389_p3 }
  0x11   :  { %1399 = shalt.err (!%p1396_p7)
}
  0x12   :  { %21 = dma.hbm_to_vmem [thread:$0]  %s1655_s0, 128, %s19_s16, [#allocation3]  }
  0x13   :  { %s1400_s5 = scalar_lea.hbm %s1657_s2, 512 }
  0x14   :  { %p1401_p8 = scmp.ne.s32.totalorder %s1657_s2, %s1400_s5  ;;  %p1404_p9 = scmp.lt.u32.totalorder %s1400_s5, %s1657_s2 }
  0x16   :  { %p1406_p10 = pnand %p1404_p9, %p1401_p8 }
  0x18   :  { %1409 = shalt.err (!%p1406_p10)
}
  0x19   :  { %s1410_s10 = scalar_lea.vmem %s1483_s18, 512  ;;  %p1415_p12 = scmp.lt.s32.totalorder %s1483_s18, %s1483_s18 }
  0x1a   :  { %p1411_p11 = scmp.ne.s32.totalorder %s1483_s18, %s1410_s10  ;;  %p1416_p13 = scmp.lt.s32.totalorder %s1410_s10, %s1410_s10 }
  0x1c   :  { %p1417_p0 = por %p1416_p13, %p1415_p12 }
  0x1e   :  { %p1418_p1 = pnand %p1417_p0, %p1411_p11 }
  0x20   :  { %1421 = shalt.err (!%p1418_p1)
}
  0x21   :  { %s1452_s0 = smov 128   ;;  %s1453_s11 = smov 8  }
  0x22   :  { %35 = dma.hbm_to_vmem [thread:$0]  %s1657_s2, 512, %s1483_s18, [#allocation6], %s1452_s0, %s1452_s0, %s1453_s11  }
  0x23   :  { %1444 = dma.done.wait [#allocation3], 128  }
  0x24   :  { %1445 = vsyncadd [#allocation3], 4294967168 }
  0x25   :  { %1446 = dma.done.wait [#allocation6], 512  }
  0x26   :  { %1447 = vsyncadd [#allocation6], 4294966784  ;;  %v1454_v0 = vmov 0.0|0.0   ;;  %vm1455_vm0 = vmmov 0   ;;  %v1456_v1 = vmov 0.0   ;;  %vm45_vm1 = vcmask 261120  }
  0x27   :  { %1275 = vmatprep.subr.bf16.mxu0 %v1454_v0  ;;  %1311 = vmatprep.subr.bf16.mxu1 %v1454_v0  ;;  %v70_v2 = vld [vmem:[#allocation5] sm:$0xff]  ;;  %v71_v3 = vld [vmem:[#allocation5 + $0x8] sm:$0xff]  ;;  %v72_v4 = vld [vmem:[#allocation5 + $0x10] sm:$0xff]  ;;  %v566_v34 = vlaneseq  ;;  %s1457_s16 = smov [#allocation7]  }
  0x28   :  { %1151 = vmatprep.mubr.msk.f32.mxu0 %vm1455_vm0, %v1456_v1  ;;  %1217 = vmatprep.mubr.msk.f32.mxu1 %vm1455_vm0, %v1456_v1  ;;  %v80_v5 = vand.u32 4294901760, %v70_v2  ;;  %v83_v6 = vand.u32 4294901760, %v71_v3  ;;  %v73_v7 = vld [vmem:[#allocation5 + $0x18] sm:$0xff]  ;;  %v86_v8 = vand.u32 4294901760, %v72_v4  ;;  %s1073_s17 = sshll.u32 %s1457_s16, 4  ;;  %s1074_s17 = int_to_ptr.vmem [resolvable:$true] %s1073_s17 }
  0x29   :  { %v44_v9 = vld [vmem:[#allocation2] sm:$0xff]  ;;  %v89_v10 = vand.u32 4294901760, %v73_v7  ;;  %v1534_v35 = vshrl.u32 %v566_v34, 7  ;;  %s1422_s18 = scalar_lea.vmem %s1074_s17, 128  ;;  %p1427_p3 = scmp.lt.s32.totalorder %s1074_s17, %s1074_s17 }
  0x2a   :  { %v46_v11 = vsel %vm45_vm1, %v44_v9, 0.0  ;;  %v53_v12 = vmul.f32 %v44_v9, %v44_v9  ;;  %v1521_v13 = vpack.c.bf16 %v83_v6, %v80_v5  ;;  %v1536_v36 = vsub.f32 %v70_v2, %v80_v5  ;;  %v66_v38 = vld [vmem:[%s1656_s1] sm:$0x1]  ;;  %p1423_p2 = scmp.ne.s32.totalorder %s1074_s17, %s1422_s18  ;;  %p1428_p4 = scmp.lt.s32.totalorder %s1422_s18, %s1422_s18 }
  0x2b   :  { %v47_v14 = vrot.slane %v46_v11, 4  ;;  %v1526_v16 = vpack.c.bf16 %v89_v10, %v86_v8  ;;  %v1538_v37 = vsub.f32 %v71_v3, %v83_v6  ;;  %v568_v39 = vsub.s32 0, %v1534_v35 }
  0x2c   :  { %v54_v15 = vsel %vm45_vm1, %v53_v12, 0.0  ;;  %1277 = vmatpush3.bf16.msra.mxu0 %v1521_v13  ;;  %1313 = vmatpush3.bf16.msra.mxu1 %v1521_v13  ;;  %v1544_v41 = vsub.f32 %v72_v4, %v86_v8  ;;  %v1546_v42 = vsub.f32 %v73_v7, %v89_v10  ;;  %v161_v44 = vand.u32 4294901760, %v1536_v36  ;;  %p1429_p5 = por %p1428_p4, %p1427_p3 }
  0x2d   :  { %v48_v17 = vadd.f32 %v47_v14, %v46_v11  ;;  %v55_v18 = vrot.slane %v54_v15, 4  ;;  %1278 = vmatprep.subr.bf16.mxu0 %v1454_v0  ;;  %1314 = vmatprep.subr.bf16.mxu1 %v1454_v0  ;;  %v168_v45 = vand.u32 4294901760, %v1538_v37  ;;  %v1288_v11 = vpack.c.bf16 %v1538_v37, %v1536_v36 }
  0x2e   :  { %v175_v48 = vand.u32 4294901760, %v1544_v41  ;;  %v182_v49 = vand.u32 4294901760, %v1546_v42  ;;  %v162_v51 = vsub.f32 %v1536_v36, %v161_v44  ;;  %v1291_v12 = vpack.c.bf16 %v1546_v42, %v1544_v41  ;;  %p1430_p6 = pnand %p1429_p5, %p1423_p2 }
  0x2f   :  { %v49_v19 = vrot.slane %v48_v17, 2  ;;  %v56_v20 = vadd.f32 %v55_v18, %v54_v15  ;;  %v169_v52 = vsub.f32 %v1538_v37, %v168_v45  ;;  %v1300_v14 = vpack.c.bf16 %v168_v45, %v161_v44 }
  0x30   :  { %1280 = vmatpush3.bf16.msra.mxu0 %v1526_v16  ;;  %1316 = vmatpush3.bf16.msra.mxu1 %v1526_v16  ;;  %v163_v58 = vand.u32 4294901760, %v162_v51  ;;  %v176_v60 = vsub.f32 %v1544_v41, %v175_v48  ;;  %v183_v61 = vsub.f32 %v1546_v42, %v182_v49  ;;  %v1303_v15 = vpack.c.bf16 %v182_v49, %v175_v48 }
  0x31   :  { %v50_v21 = vadd.f32 %v49_v19, %v48_v17  ;;  %v57_v22 = vrot.slane %v56_v20, 2  ;;  %1281 = vmatprep.subr.bf16.mxu0 %v1454_v0  ;;  %1317 = vmatprep.subr.bf16.mxu1 %v1454_v0  ;;  %v170_v59 = vand.u32 4294901760, %v169_v52  ;;  %v74_v17 = vld [vmem:[%s1658_s3] sm:$0x1] }
  0x32   :  { %v177_v5 = vand.u32 4294901760, %v176_v60  ;;  %v184_v6 = vand.u32 4294901760, %v183_v61 }
  0x33   :  { %v51_v23 = vrot.slane %v50_v21, 1  ;;  %v58_v24 = vadd.f32 %v57_v22, %v56_v20  ;;  %v1282_v4 = vpack.c.bf16 %v170_v59, %v163_v58 }
  0x34   :  { %v1285_v10 = vpack.c.bf16 %v184_v6, %v177_v5 }
  0x35   :  { %v52_v25 = vadd.f32 %v51_v23, %v50_v21  ;;  %v59_v26 = vrot.slane %v58_v24, 1 }
  0x37   :  { %v60_v27 = vadd.f32 %v59_v26, %v58_v24  ;;  %v61_v28 = vmul.f32 0.125, %v52_v25 }
  0x39   :  { %v62_v29 = vmul.f32 0.125, %v60_v27  ;;  %v63_v30 = vmul.f32 %v61_v28, %v61_v28 }
  0x3b   :  { %v64_v31 = vsub.f32 %v62_v29, %v63_v30 }
  0x3d   :  { %v65_v32 = vmax.f32 %v64_v31, 0.0 }
  0x3f   :  { %v67_v33 = vadd.f32 1e-05, %v65_v32 }
  0x41   :  { %1376 = vrsqrt.f32 %v67_v33 }
  0x4b   :  { %v1377_v40 = vpop.eup %1376 }
  0x4c   :  { %v69_v43 = vmul.f32 %v1377_v40, %v66_v38 }
  0x4e   :  { %v75_v46 = vmul.f32 %v69_v43, %v61_v28  ;;  %v569_v47 = vrot.slane %v69_v43, %v568_v39 }
  0x50   :  { %v77_v50 = vsel %vm45_vm1, %v75_v46, 0  ;;  %v571_v53 = vmul.f32 %v569_v47, %v44_v9 }
  0x51   :  { %v1561_v54 = vand.u32 4294901760, %v77_v50 }
  0x52   :  { %v579_v55 = vsel %vm45_vm1, %v571_v53, 0 }
  0x53   :  { %v149_v56 = vsub.f32 %v77_v50, %v1561_v54  ;;  %v1565_v57 = vand.u32 4294901760, %v579_v55 }
  0x55   :  { %v150_v62 = vand.u32 4294901760, %v149_v56  ;;  %v651_v63 = vsub.f32 %v579_v55, %v1565_v57 }
  0x57   :  { %v151_v2 = vsub.f32 %v149_v56, %v150_v62  ;;  %v652_v3 = vand.u32 4294901760, %v651_v63 }
  0x59   :  { %v152_v7 = vand.u32 4294901760, %v151_v2  ;;  %v653_v8 = vsub.f32 %v651_v63, %v652_v3 }
  0x5b   :  { %1152 = vmatmul.mubr.f32.vlgmr.msra.gmra.mrb[0].mxu0 %v152_v7  ;;  %v654_v9 = vand.u32 4294901760, %v653_v8 }
  0x5c   :  { %1283 = vmatpush3.bf16.msra.mxu0 %v1282_v4  ;;  %1162 = vmatprep.mubr.msk.f32.mxu0 %vm1455_vm0, %v1456_v1 }
  0x5d   :  { %1218 = vmatmul.mubr.f32.vlgmr.msra.gmra.mrb[0].mxu1 %v654_v9  ;;  %1284 = vmatprep.subr.bf16.mxu0 %v1454_v0 }
  0x5e   :  { %1319 = vmatpush3.bf16.msra.mxu1 %v1282_v4  ;;  %1228 = vmatprep.mubr.msk.f32.mxu1 %vm1455_vm0, %v1456_v1 }
  0x5f   :  { %1320 = vmatprep.subr.bf16.mxu1 %v1454_v0 }
  0x60   :  { %1286 = vmatpush3.bf16.msra.mxu0 %v1285_v10 }
  0x61   :  { %1287 = vmatprep.subr.bf16.mxu0 %v1454_v0 }
  0x62   :  { %1322 = vmatpush3.bf16.msra.mxu1 %v1285_v10 }
  0x63   :  { %1163 = vmatmul.mubr.f32.vlgmr.msra.gmra.mrb[0].mxu0 %v1561_v54  ;;  %1323 = vmatprep.subr.bf16.mxu1 %v1454_v0 }
  0x64   :  { %1289 = vmatpush3.bf16.msra.mxu0 %v1288_v11  ;;  %1173 = vmatprep.mubr.msk.f32.mxu0 %vm1455_vm0, %v1456_v1 }
  0x65   :  { %1229 = vmatmul.mubr.f32.vlgmr.msra.gmra.mrb[0].mxu1 %v1565_v57  ;;  %1290 = vmatprep.subr.bf16.mxu0 %v1454_v0 }
  0x66   :  { %1325 = vmatpush3.bf16.msra.mxu1 %v1288_v11  ;;  %1239 = vmatprep.mubr.msk.f32.mxu1 %vm1455_vm0, %v1456_v1 }
  0x67   :  { %1326 = vmatprep.subr.bf16.mxu1 %v1454_v0 }
  0x68   :  { %1292 = vmatpush3.bf16.msra.mxu0 %v1291_v12 }
  0x69   :  { %1293 = vmatprep.subr.bf16.mxu0 %v1454_v0 }
  0x6a   :  { %1328 = vmatpush3.bf16.msra.mxu1 %v1291_v12 }
  0x6b   :  { %1174 = vmatmul.mubr.f32.vlgmr.msra.gmra.mrb[0].mxu0 %v149_v56  ;;  %1329 = vmatprep.subr.bf16.mxu1 %v1454_v0 }
  0x6c   :  { %1295 = vmatpush3.bf16.msra.mxu0 %v1521_v13  ;;  %1184 = vmatprep.mubr.msk.f32.mxu0 %vm1455_vm0, %v1456_v1 }
  0x6d   :  { %1240 = vmatmul.mubr.f32.vlgmr.msra.gmra.mrb[0].mxu1 %v651_v63  ;;  %1296 = vmatprep.subr.bf16.mxu0 %v1454_v0 }
  0x6e   :  { %1331 = vmatpush3.bf16.msra.mxu1 %v1521_v13  ;;  %1250 = vmatprep.mubr.msk.f32.mxu1 %vm1455_vm0, %v1456_v1 }
  0x6f   :  { %1332 = vmatprep.subr.bf16.mxu1 %v1454_v0 }
  0x70   :  { %1298 = vmatpush3.bf16.msra.mxu0 %v1526_v16 }
  0x71   :  { %1299 = vmatprep.subr.bf16.mxu0 %v1454_v0 }
  0x72   :  { %1334 = vmatpush3.bf16.msra.mxu1 %v1526_v16 }
  0x73   :  { %1185 = vmatmul.mubr.f32.vlgmr.msra.gmra.mrb[0].mxu0 %v150_v62  ;;  %1335 = vmatprep.subr.bf16.mxu1 %v1454_v0 }
  0x74   :  { %1301 = vmatpush3.bf16.msra.mxu0 %v1300_v14  ;;  %1195 = vmatprep.mubr.msk.f32.mxu0 %vm1455_vm0, %v1456_v1 }
  0x75   :  { %1251 = vmatmul.mubr.f32.vlgmr.msra.gmra.mrb[0].mxu1 %v652_v3  ;;  %1302 = vmatprep.subr.bf16.mxu0 %v1454_v0 }
  0x76   :  { %1337 = vmatpush3.bf16.msra.mxu1 %v1300_v14  ;;  %1261 = vmatprep.mubr.msk.f32.mxu1 %vm1455_vm0, %v1456_v1 }
  0x77   :  { %1338 = vmatprep.subr.bf16.mxu1 %v1454_v0 }
  0x78   :  { %1304 = vmatpush3.bf16.msra.mxu0 %v1303_v15 }
  0x79   :  { %1305 = vmatprep.subr.bf16.mxu0 %v1454_v0 }
  0x7a   :  { %1340 = vmatpush3.bf16.msra.mxu1 %v1303_v15 }
  0x7b   :  { %1196 = vmatmul.mubr.f32.vlgmr.msra.gmra.mrb[0].mxu0 %v1561_v54  ;;  %1341 = vmatprep.subr.bf16.mxu1 %v1454_v0 }
  0x7c   :  { %1307 = vmatpush3.bf16.msra.mxu0 %v1521_v13  ;;  %1206 = vmatprep.mubr.msk.f32.mxu0 %vm1455_vm0, %v1456_v1 }
  0x7d   :  { %1262 = vmatmul.mubr.f32.vlgmr.msra.gmra.mrb[0].mxu1 %v1565_v57  ;;  %1308 = vmatprep.subr.bf16.mxu0 %v1454_v0 }
  0x7e   :  { %1343 = vmatpush3.bf16.msra.mxu1 %v1521_v13  ;;  %1272 = vmatprep.mubr.msk.f32.mxu1 %vm1455_vm0, %v1456_v1 }
  0x7f   :  { %1344 = vmatprep.subr.bf16.mxu1 %v1454_v0 }
  0x80   :  { %1310 = vmatpush3.bf16.msra.mxu0 %v1526_v16 }
  0x82   :  { %1346 = vmatpush3.bf16.msra.mxu1 %v1526_v16 }
  0x83   :  { %1207 = vmatmul.mubr.f32.vlgmr.msra.gmra.mrb[0].mxu0 %v1561_v54 }
  0x85   :  { %1273 = vmatmul.mubr.f32.vlgmr.msra.gmra.mrb[0].mxu1 %v1565_v57 }
 0x156   :  { %v560_v18 = vpop.f32.mrb[0].mxu0 }
 0x157   :  { %v564_v19 = vsub.f32 %v74_v17, %v560_v18  ;;  %v1208_v13 = vpop.f32.mrb[1].mxu0 }
 0x158   :  { %v1062_v20 = vpop.f32.mrb[0].mxu1 }
 0x159   :  { %v576_v0 = vrot.slane %v564_v19, %v568_v39  ;;  %v1274_v1 = vpop.f32.mrb[1].mxu1 }
 0x15b   :  { %v1347_v21 = vadd.f32 %v1062_v20, %v576_v0 }
 0x15d   :  { %1066 = vst [vmem:[#allocation7] sm:$0xff] %v1347_v21 }
 0x15e   :  { %1433 = shalt.err (!%p1430_p6)
}
 0x15f   :  { %s1434_s20 = scalar_lea.hbm %s1659_s4, 128 }
 0x160   :  { %p1435_p7 = scmp.ne.s32.totalorder %s1659_s4, %s1434_s20  ;;  %p1438_p8 = scmp.lt.u32.totalorder %s1434_s20, %s1659_s4 }
 0x162   :  { %p1440_p9 = pnand %p1438_p8, %p1435_p7 }
 0x164   :  { %1443 = shalt.err (!%p1440_p9)
}
 0x165   :  { %1076 = dma.vmem_to_hbm [thread:$0]  %s1074_s17, 128, %s1659_s4, [#allocation4]  }
 0x166   :  { %1448 = dma.done.wait [#allocation4], 128  }
 0x167   :  { %1449 = vsyncadd [#allocation4], 4294967168 }
 0x168   :  { %1080 = vsyncpa [#allocation3], 1 }
 0x169   :  { %1081 = vsyncpa [#allocation6], 1 }
 0x16a   :  { %1082 = vsyncpa [#allocation4], 1 }

</bundles_post_ra>
